<compile_context>
chip_gen: v7x
topology: tpu7x:2x2x1
jax: 0.10.0
libtpu: 0.0.40
codegen_flags: <defaults>
</compile_context>

<pallas_src>
import math

import jax
import jax.numpy as jnp
from jax import lax
from jax.experimental import pallas as pl
from jax.experimental.pallas import tpu as pltpu


def _round_up(n, m):
    return ((n + m - 1) // m) * m


def _fpn_kernel(x_ref, w_ref, b_ref, tri_ref, csum_ref, tauh_ref, ent_ref):
    x = x_ref[...]                      # (TB, in_dim)   bf16 (batch tile)
    w = w_ref[...]                      # (in_dim, D)    bf16 (resident)
    b = b_ref[...]                      # (1, D)         f32  (resident)
    tri = tri_ref[...]                  # (D, D)         f32  (resident)

    # Linear layer on the MXU: bf16 x bf16 -> f32 accumulation.
    logits = jnp.dot(x, w, preferred_element_type=jnp.float32) + b

    # Numerically-stable softmax + entropy (== -sum(p * log p)), all in f32.
    m = jnp.max(logits, axis=-1, keepdims=True)
    z = logits - m
    e = jnp.exp(z)
    s = jnp.sum(e, axis=-1, keepdims=True)
    # approx=False on purpose: taus are cumulative, approx reciprocal breaks
    # the tight tolerances.
    p = e * pl.reciprocal(s, approx=False)
    logp = z - jnp.log(s)
    ent = -jnp.sum(p * logp, axis=-1, keepdims=True)         # (TB, 1)

    # Cumulative sum along the lane axis via a precomputed upper-triangular
    # ones matmul (no cross-lane scan; D is tiny so this is cheap on the MXU).
    csum = jnp.dot(p, tri, preferred_element_type=jnp.float32)   # (TB, D)

    # Lane-dense stores only; taus = [0 | csum] is assembled in the wrapper.
    csum_ref[...] = csum
    tauh_ref[...] = csum - 0.5 * p      # == (taus[:, :-1] + taus[:, 1:]) / 2
    ent_ref[...] = ent


def fraction_proposal(x, weight, bias, *, block_b=1024):
    """x: (B, in_dim); weight: (out_dim, in_dim); bias: (out_dim,).

    Returns (taus (B, out_dim+1), tau_hats (B, out_dim), ent (B,)), all f32.
    """
    B, in_dim = x.shape
    out_dim = weight.shape[0]

    # --- batch tiling: multiple of 16 (bf16 sublane pack), padded to a whole
    # number of tiles. Keep tiles modest so 2x-buffered x fits v7x VMEM.
    tb = min(int(block_b), _round_up(B, 16))
    tb = _round_up(tb, 16)
    pb = _round_up(B, tb)
    grid = (pb // tb,)

    x_f = jnp.asarray(x, jnp.float32)
    if pb != B:
        x_f = jnp.pad(x_f, ((0, pb - B), (0, 0)))     # deterministic zero rows

    # bf16 input traffic; weights/bias/tri are tiny residents.
    x_bf = x_f.astype(jnp.bfloat16)                              # (pb, in_dim)
    w_t = jnp.asarray(weight, jnp.float32).T.astype(jnp.bfloat16)  # (in_dim, D)
    b2 = jnp.asarray(bias, jnp.float32).reshape(1, out_dim)       # (1, D)

    # Upper-triangular ones (D, D): csum = p @ tri. Built once in the wrapper.
    ri = lax.broadcasted_iota(jnp.int32, (out_dim, out_dim), 0)
    ci = lax.broadcasted_iota(jnp.int32, (out_dim, out_dim), 1)
    tri = jnp.where(ri <= ci, 1.0, 0.0).astype(jnp.float32)

    csum, tau_hats, ent = pl.pallas_call(
        _fpn_kernel,
        grid=grid,
        out_shape=(
            jax.ShapeDtypeStruct((pb, out_dim), jnp.float32),
            jax.ShapeDtypeStruct((pb, out_dim), jnp.float32),
            jax.ShapeDtypeStruct((pb, 1), jnp.float32),
        ),
        in_specs=[
            pl.BlockSpec((tb, in_dim), lambda i: (i, 0)),          # x tile
            pl.BlockSpec((in_dim, out_dim), lambda i: (0, 0)),     # W (resident)
            pl.BlockSpec((1, out_dim), lambda i: (0, 0)),          # bias (resident)
            pl.BlockSpec((out_dim, out_dim), lambda i: (0, 0)),    # tri (resident)
        ],
        out_specs=(
            pl.BlockSpec((tb, out_dim), lambda i: (i, 0)),
            pl.BlockSpec((tb, out_dim), lambda i: (i, 0)),
            pl.BlockSpec((tb, 1), lambda i: (i, 0)),
        ),
        compiler_params=pltpu.CompilerParams(
            dimension_semantics=("parallel",),
        ),
    )(x_bf, w_t, b2, tri)

    # Wrapper-side assembly (free layout plumbing): taus = [0 | csum].
    csum = csum[:B]
    taus = jnp.pad(csum, ((0, 0), (1, 0)))
    return taus, tau_hats[:B], ent[:B, 0]


def _reference(x, weight, bias):
    """Precision-matched reference: bf16 matmul (f32 accum), f32 elsewhere."""
    logits = jnp.dot(
        x.astype(jnp.bfloat16),
        weight.T.astype(jnp.bfloat16),
        preferred_element_type=jnp.float32,
    ) + bias
    p = jax.nn.softmax(logits, axis=-1)
    ent = -jnp.sum(p * jnp.log(p), axis=-1)
    csum = jnp.cumsum(p, axis=-1)
    taus = jnp.concatenate(
        [jnp.zeros((x.shape[0], 1), jnp.float32), csum], axis=-1
    )
    tau_hats = (taus[:, :-1] + taus[:, 1:]) / 2
    return taus, tau_hats, ent


if __name__ == "__main__":
    B, in_dim, out_dim = 8, 32, 8

    key = jax.random.PRNGKey(0)
    kx, kw = jax.random.split(key)

    # Deterministic parameter init matching nn.init.xavier_uniform_ + zero bias.
    bound = math.sqrt(6.0 / (in_dim + out_dim))
    weight = jax.random.uniform(
        kw, (out_dim, in_dim), jnp.float32, minval=-bound, maxval=bound
    )
    bias = jnp.zeros((out_dim,), jnp.float32)

    x = jax.random.normal(kx, (B, in_dim), jnp.float32)

    taus, tau_hats, ent = fraction_proposal(x, weight, bias)
    jax.block_until_ready((taus, tau_hats, ent))

    r_taus, r_tau_hats, r_ent = _reference(x, weight, bias)
    assert taus.shape == (B, out_dim + 1)
    assert tau_hats.shape == (B, out_dim)
    assert ent.shape == (B,)
    assert jnp.allclose(taus, r_taus, atol=1e-4), "taus mismatch"
    assert jnp.allclose(tau_hats, r_tau_hats, atol=1e-4), "tau_hats mismatch"
    assert jnp.allclose(ent, r_ent, atol=1e-4), "entropy mismatch"

    print("KERNEL_OK")
</pallas_src>

<mosaic_0001>
module attributes {stable_mosaic.version = 11 : i64} {
  func.func @_fpn_kernel(%arg0: i32, %arg1: memref<16x32xbf16, #tpu.memory_space<vmem>>, %arg2: memref<32x8xbf16, #tpu.memory_space<vmem>>, %arg3: memref<1x8xf32, #tpu.memory_space<vmem>>, %arg4: memref<8x8xf32, #tpu.memory_space<vmem>>, %arg5: memref<16x8xf32, #tpu.memory_space<vmem>>, %arg6: memref<16x8xf32, #tpu.memory_space<vmem>>, %arg7: memref<16x1xf32, #tpu.memory_space<vmem>>) attributes {dimension_semantics = [#tpu.dimension_semantics<parallel>], iteration_bounds = array<i64: 1>, scalar_prefetch = 0 : i64, scratch_operands = 0 : i64, tpu.core_type = #tpu.core_type<tc>, window_params = [{transform_indices = @transform_0, window_bounds = array<i64: 16, 32>}, {pipeline_mode = #tpu.pipeline_mode<synchronous>, transform_indices = @transform_1, window_bounds = array<i64: 32, 8>}, {pipeline_mode = #tpu.pipeline_mode<synchronous>, transform_indices = @transform_2, window_bounds = array<i64: 1, 8>}, {pipeline_mode = #tpu.pipeline_mode<synchronous>, transform_indices = @transform_3, window_bounds = array<i64: 8, 8>}, {transform_indices = @transform_4, window_bounds = array<i64: 16, 8>}, {transform_indices = @transform_5, window_bounds = array<i64: 16, 8>}, {transform_indices = @transform_6, window_bounds = array<i64: 16, 1>}]} {
    %c0 = arith.constant 0 : index
    %c0_0 = arith.constant 0 : index
    %0 = vector.load %arg1[%c0, %c0_0] : memref<16x32xbf16, #tpu.memory_space<vmem>>, vector<16x32xbf16>
    %c0_1 = arith.constant 0 : index
    %c0_2 = arith.constant 0 : index
    %1 = vector.load %arg2[%c0_1, %c0_2] : memref<32x8xbf16, #tpu.memory_space<vmem>>, vector<32x8xbf16>
    %c0_3 = arith.constant 0 : index
    %c0_4 = arith.constant 0 : index
    %2 = vector.load %arg3[%c0_3, %c0_4] : memref<1x8xf32, #tpu.memory_space<vmem>>, vector<1x8xf32>
    %c0_5 = arith.constant 0 : index
    %c0_6 = arith.constant 0 : index
    %3 = vector.load %arg4[%c0_5, %c0_6] : memref<8x8xf32, #tpu.memory_space<vmem>>, vector<8x8xf32>
    %cst = arith.constant dense<0.000000e+00> : vector<16x8xf32>
    %4 = tpu.matmul %0, %1, %cst {dimension_numbers = #tpu.dot_dimension_numbers<[1], [0], [0], [1], [0, 0, 1, 1], [], []>} : vector<16x32xbf16>, vector<32x8xbf16>, vector<16x8xf32> -> vector<16x8xf32>
    %5 = vector.broadcast %2 : vector<1x8xf32> to vector<16x8xf32>
    %6 = arith.addf %4, %5 : vector<16x8xf32>
    %cst_7 = arith.constant dense<0xFF800000> : vector<16xf32>
    %7 = vector.multi_reduction <maximumf>, %6, %cst_7 [1] : vector<16x8xf32> to vector<16xf32>
    %8 = vector.shape_cast %7 : vector<16xf32> to vector<16x1xf32>
    %9 = vector.broadcast %8 : vector<16x1xf32> to vector<16x8xf32>
    %10 = arith.subf %6, %9 : vector<16x8xf32>
    %11 = math.exp %10 : vector<16x8xf32>
    %cst_8 = arith.constant dense<0.000000e+00> : vector<16xf32>
    %12 = vector.multi_reduction <add>, %11, %cst_8 [1] : vector<16x8xf32> to vector<16xf32>
    %13 = vector.shape_cast %12 : vector<16xf32> to vector<16x1xf32>
    %14 = tpu.reciprocal %13 : vector<16x1xf32> -> vector<16x1xf32>
    %15 = vector.broadcast %14 : vector<16x1xf32> to vector<16x8xf32>
    %16 = arith.mulf %11, %15 : vector<16x8xf32>
    %17 = math.log %13 : vector<16x1xf32>
    %18 = vector.broadcast %17 : vector<16x1xf32> to vector<16x8xf32>
    %19 = arith.subf %10, %18 : vector<16x8xf32>
    %20 = arith.mulf %16, %19 : vector<16x8xf32>
    %cst_9 = arith.constant dense<0.000000e+00> : vector<16xf32>
    %21 = vector.multi_reduction <add>, %20, %cst_9 [1] : vector<16x8xf32> to vector<16xf32>
    %22 = vector.shape_cast %21 : vector<16xf32> to vector<16x1xf32>
    %cst_10 = arith.constant 0.000000e+00 : f32
    %23 = vector.broadcast %cst_10 : f32 to vector<16x1xf32>
    %24 = arith.subf %23, %22 : vector<16x1xf32>
    %cst_11 = arith.constant dense<0.000000e+00> : vector<16x8xf32>
    %25 = tpu.matmul %16, %3, %cst_11 {dimension_numbers = #tpu.dot_dimension_numbers<[1], [0], [0], [1], [0, 0, 1, 1], [], []>} : vector<16x8xf32>, vector<8x8xf32>, vector<16x8xf32> -> vector<16x8xf32>
    %c0_12 = arith.constant 0 : index
    %c0_13 = arith.constant 0 : index
    %26 = vector.load %arg5[%c0_12, %c0_13] : memref<16x8xf32, #tpu.memory_space<vmem>>, vector<16x8xf32>
    tpu.vector_store %arg5[%c0_12, %c0_13], %25 {strides = array<i32>} : memref<16x8xf32, #tpu.memory_space<vmem>>, vector<16x8xf32>,
    %cst_14 = arith.constant 5.000000e-01 : f32
    %27 = vector.broadcast %cst_14 : f32 to vector<16x8xf32>
    %28 = arith.mulf %27, %16 : vector<16x8xf32>
    %29 = arith.subf %25, %28 : vector<16x8xf32>
    %c0_15 = arith.constant 0 : index
    %c0_16 = arith.constant 0 : index
    %30 = vector.load %arg6[%c0_15, %c0_16] : memref<16x8xf32, #tpu.memory_space<vmem>>, vector<16x8xf32>
    tpu.vector_store %arg6[%c0_15, %c0_16], %29 {strides = array<i32>} : memref<16x8xf32, #tpu.memory_space<vmem>>, vector<16x8xf32>,
    %c0_17 = arith.constant 0 : index
    %c0_18 = arith.constant 0 : index
    %31 = vector.load %arg7[%c0_17, %c0_18] : memref<16x1xf32, #tpu.memory_space<vmem>>, vector<16x1xf32>
    tpu.vector_store %arg7[%c0_17, %c0_18], %24 {strides = array<i32>} : memref<16x1xf32, #tpu.memory_space<vmem>>, vector<16x1xf32>,
    return
  }
  func.func @transform_0(%arg0: i32) -> (i32, i32) {
    %c0_i32 = arith.constant 0 : i32
    %c0_i32_0 = arith.constant 0 : i32
    return %arg0, %c0_i32 : i32, i32
  }
  func.func @transform_1(%arg0: i32) -> (i32, i32) {
    %c0_i32 = arith.constant 0 : i32
    %c0_i32_0 = arith.constant 0 : i32
    %c0_i32_1 = arith.constant 0 : i32
    return %c0_i32, %c0_i32_0 : i32, i32
  }
  func.func @transform_2(%arg0: i32) -> (i32, i32) {
    %c0_i32 = arith.constant 0 : i32
    %c0_i32_0 = arith.constant 0 : i32
    %c0_i32_1 = arith.constant 0 : i32
    return %c0_i32, %c0_i32_0 : i32, i32
  }
  func.func @transform_3(%arg0: i32) -> (i32, i32) {
    %c0_i32 = arith.constant 0 : i32
    %c0_i32_0 = arith.constant 0 : i32
    %c0_i32_1 = arith.constant 0 : i32
    return %c0_i32, %c0_i32_0 : i32, i32
  }
  func.func @transform_4(%arg0: i32) -> (i32, i32) {
    %c0_i32 = arith.constant 0 : i32
    %c0_i32_0 = arith.constant 0 : i32
    return %arg0, %c0_i32 : i32, i32
  }
  func.func @transform_5(%arg0: i32) -> (i32, i32) {
    %c0_i32 = arith.constant 0 : i32
    %c0_i32_0 = arith.constant 0 : i32
    return %arg0, %c0_i32 : i32, i32
  }
  func.func @transform_6(%arg0: i32) -> (i32, i32) {
    %c0_i32 = arith.constant 0 : i32
    %c0_i32_0 = arith.constant 0 : i32
    return %arg0, %c0_i32 : i32, i32
  }
}

</mosaic_0001>

<bundles_post_ra>
// kernel: tpu_custom_call.1
= control target key start
LH: loop header
LB: loop body
LE: loop exit
PB: predicated region body
PF: predicated region fallthrough
CT: control target
= control target key end

     0   :  { %v283_v0 = vmov 0.0   ;;  %vm284_vm0 = vmmov 0   ;;  %vm52_vm1 = vcmask 261120   ;;  %vm97_vm2 = vcmask 64512   ;;  %s365_s1 = inlined_call_operand.vmem [shape: bf16[32,8], index: 1, kind: input, shape index: {}]   ;;  %s366_s0 = inlined_call_operand.vmem [shape: bf16[16,32], index: 0, kind: input, shape index: {}]   ;;  %s367_s2 = inlined_call_operand.vmem [shape: f32[1,8], index: 2, kind: input, shape index: {}]   ;;  %s368_s3 = inlined_call_operand.vmem [shape: f32[8,8], index: 3, kind: input, shape index: {}]   ;;  %s369_s6 = inlined_call_operand.vmem [shape: f32[16,1], index: 6, kind: output, shape index: {2}]   ;;  %s370_s4 = inlined_call_operand.vmem [shape: f32[16,8], index: 4, kind: output, shape index: {0}]   ;;  %s371_s5 = inlined_call_operand.vmem [shape: f32[16,8], index: 5, kind: output, shape index: {1}]  }
   0x1   :  { %253 = vmatprep.subr.bf16.mxu0 %v283_v0  ;;  %v268_v1 = vld [vmem:[%s365_s1] sm:$0xff]   ;;  %257 = vmatprep.mubr.msk.bf16.mxu0 %vm284_vm0, %v283_v0  ;;  %v269_v2 = vld [vmem:[%s365_s1 + $0x8] sm:$0xff]   ;;  %vm225_vm3 = vcmask 7168  }
   0x2   :  { %254 = vmatpush3.bf16.msra.mxu0 %v268_v1  ;;  %v270_v3 = vld [vmem:[%s366_s0] sm:$0xff]  }
   0x3   :  { %255 = vmatprep.subr.bf16.mxu0 %v283_v0  ;;  %v240_v4 = vld [vmem:[%s367_s2] ss:$0 sm:$0xff] }
   0x4   :  { %v28_v23 = vld [vmem:[%s368_s3] sm:$0xff] }
   0x5   :  { %261 = vmatprep.subr.mxu1 %v28_v23 }
   0x6   :  { %256 = vmatpush3.bf16.msra.mxu0 %v269_v2  ;;  %262 = vmatpush3.msra.mxu1 %v28_v23 }
   0x9   :  { %258 = vmatmul.mubr.msk.bf16.vlgmr.msra.gmra.mrb[0].mxu0 %vm52_vm1, %v270_v3 }
  0xdc   :  { %v90_v5 = vpop.f32.mrb[0].mxu0 }
  0xdd   :  { %v91_v6 = vadd.f32 %v240_v4, %v90_v5  ;;  %v259_v7 = vpop.f32.mrb[1].mxu0 }
  0xde   :  { %v93_v8 = vpop.f32.mrb[2].mxu0 }
  0xdf   :  { %v94_v9 = vadd.f32 %v240_v4, %v93_v8  ;;  %v260_v10 = vpop.f32.mrb[3].mxu0  ;;  %v98_v11 = vsel %vm97_vm2, %v91_v6, -inf }
  0xe0   :  { %99 = vmax.xlane.f32.xlu0 %v98_v11 }
  0xe1   :  { %v101_v12 = vsel %vm97_vm2, %v94_v9, -inf }
  0xe4   :  { %102 = vmax.xlane.f32.xlu0 %v101_v12 }
 0x16d   :  { %v100_v13 = vpop.xlane.xlu0 %99 }
 0x16e   :  { %v104_v14 = vsub.f32 %v91_v6, %v100_v13 }
 0x170   :  { %v106_v15 = vmul.f32 1.442695, %v104_v14 }
 0x171   :  { %v103_v16 = vpop.xlane.xlu0 %102 }
 0x172   :  { %271 = vpow2.f32 %v106_v15  ;;  %v105_v17 = vsub.f32 %v94_v9, %v103_v16 }
 0x174   :  { %v108_v18 = vmul.f32 1.442695, %v105_v17 }
 0x176   :  { %273 = vpow2.f32 %v108_v18 }
 0x17c   :  { %v272_v19 = vpop.eup %271 }
 0x17d   :  { %v110_v20 = vsel %vm97_vm2, %v272_v19, 0.0 }
 0x17e   :  { %111 = vadd.xlane.f32.xlu1 %v110_v20 }
 0x180   :  { %v274_v21 = vpop.eup %273 }
 0x181   :  { %v113_v22 = vsel %vm97_vm2, %v274_v21, 0.0 }
 0x182   :  { %114 = vadd.xlane.f32.xlu1 %v113_v22 }
 0x20b   :  { %v112_v24 = vpop.xlane.xlu1 %111 }
 0x20c   :  { %275 = vrcp.f32 %v112_v24 }
 0x20d   :  { %277 = vlog2.f32 %v112_v24 }
 0x20f   :  { %v115_v25 = vpop.xlane.xlu1 %114 }
 0x210   :  { %279 = vrcp.f32 %v115_v25 }
 0x211   :  { %281 = vlog2.f32 %v115_v25 }
 0x216   :  { %v276_v26 = vpop.eup %275 }
 0x217   :  { %v278_v27 = vpop.eup %277  ;;  %v118_v28 = vmul.f32 %v276_v26, %v272_v19 }
 0x218   :  { %v121_v29 = vmul.f32 0.6931472, %v278_v27 }
 0x219   :  { %263 = vmatprep.mubr.msk.f32.mxu1 %vm97_vm2, %v118_v28  ;;  %v219_v46 = vmul.f32 0.5, %v118_v28 }
 0x21a   :  { %v280_v30 = vpop.eup %279  ;;  %v124_v31 = vsub.f32 %v104_v14, %v121_v29 }
 0x21b   :  { %v282_v32 = vpop.eup %281  ;;  %v119_v33 = vmul.f32 %v280_v30, %v274_v21 }
 0x21c   :  { %v123_v34 = vmul.f32 0.6931472, %v282_v32  ;;  %v126_v35 = vmul.f32 %v124_v31, %v118_v28 }
 0x21d   :  { %264 = vmatmul.mubr.msk.f32.vlgmr.msra.gmra.mrb[0].mxu1 %vm97_vm2, %v119_v33  ;;  %v220_v44 = vmul.f32 0.5, %v119_v33 }
 0x21e   :  { %v128_v36 = vsel %vm97_vm2, %v126_v35, 0.0  ;;  %v125_v37 = vsub.f32 %v105_v17, %v123_v34 }
 0x21f   :  { %129 = vadd.xlane.f32.xlu0 %v128_v36 }
 0x220   :  { %v127_v38 = vmul.f32 %v125_v37, %v119_v33 }
 0x222   :  { %v131_v39 = vsel %vm97_vm2, %v127_v38, 0.0 }
 0x223   :  { %132 = vadd.xlane.f32.xlu1 %v131_v39 }
 0x2ac   :  { %v130_v40 = vpop.xlane.xlu0 %129 }
 0x2ad   :  { %v134_v41 = vsub.f32 0.0, %v130_v40 }
 0x2af   :  { %226 = vst.msk [vmem:[%s369_s6] sm:$0xff] %vm225_vm3, %v134_v41 }
 0x2b0   :  { %v133_v42 = vpop.xlane.xlu1 %132 }
 0x2b1   :  { %v135_v43 = vsub.f32 0.0, %v133_v42 }
 0x2b3   :  { %227 = vst.msk [vmem:[%s369_s6 + $0x8] sm:$0xff] %vm225_vm3, %v135_v43 }
 0x2f0   :  { %v265_v45 = vpop.f32.mrb[0].mxu1 }
 0x2f1   :  { %218 = vst.msk [vmem:[%s370_s4 + $0x8] sm:$0xff] %vm97_vm2, %v265_v45  ;;  %v222_v47 = vsub.f32 %v265_v45, %v220_v44  ;;  %v208_v48 = vpop.f32.mrb[1].mxu1 }
 0x2f2   :  { %217 = vst.msk [vmem:[%s370_s4] sm:$0xff] %vm97_vm2, %v208_v48  ;;  %v221_v49 = vsub.f32 %v208_v48, %v219_v46 }
 0x2f3   :  { %224 = vst.msk [vmem:[%s371_s5 + $0x8] sm:$0xff] %vm97_vm2, %v222_v47 }
 0x2f4   :  { %223 = vst.msk [vmem:[%s371_s5] sm:$0xff] %vm97_vm2, %v221_v49 }

</bundles_post_ra>
